<compile_context>
chip_gen: v7x
topology: tpu7x:2x2x1
jax: 0.10.0
libtpu: 0.0.40
codegen_flags: <defaults>
</compile_context>

<pallas_src>
import functools

import jax
import jax.numpy as jnp
from jax.experimental import pallas as pl
from jax.experimental.pallas import tpu as pltpu

LANE = 128
SUBLANE = 8
CHUNK_ROWS = 512            # in-kernel chunk: 512*128*4B = 256 KiB per temporary
MAX_TILE_ROWS = 8192        # 4 MiB per f32 input block -> 16 MiB double-buffered
MAX_TILE_FRAMES = 4096      # fallback path block cap (lane-padded in VMEM)
MIN_STEPS = 4               # keep >= ~4 grid steps so the DMA pipeline overlaps
VMEM_LIMIT_BYTES = 48 * 1024 * 1024


def _round_up(x, m):
    return (x + m - 1) // m * m


# --------------------------------------------------------------------------- #
# Lane-dense path: C divides 128 and B*T*C % 128 == 0 (zero-copy reshape).     #
# --------------------------------------------------------------------------- #
def _lane_dense_kernel(p_ref, t_ref, out_ref, acc_sq_ref, acc_dd_ref, *,
                       C, rows, tile_rows, need_row_mask,
                       inv_direct, two_inv_first, inv_temporal):
    i = pl.program_id(0)

    @pl.when(i == 0)
    def _init():
        acc_sq_ref[...] = jnp.zeros_like(acc_sq_ref)
        acc_dd_ref[...] = jnp.zeros_like(acc_dd_ref)

    def chunk_body(c, carry):
        sq, dsq = carry
        r0 = pl.multiple_of(c * CHUNK_ROWS, CHUNK_ROWS)
        d = (p_ref[pl.ds(r0, CHUNK_ROWS), :].astype(jnp.float32)
             - t_ref[pl.ds(r0, CHUNK_ROWS), :].astype(jnp.float32))
        if need_row_mask:
            # OOB rows of the partial last tile hold undefined data: select them
            # to zero (jnp.where, not multiply) before squaring.
            row_id = (i * tile_rows + r0
                      + jax.lax.broadcasted_iota(jnp.int32, (CHUNK_ROWS, LANE), 0))
            d = jnp.where(row_id < rows, d, 0.0)
        # d[c] - d[c-1] via a lane rotation (XLU slot). Frame-start lanes
        # (coef == 0) pick up a cross-frame value and are masked in the epilogue.
        dd = d - pltpu.roll(d, shift=1, axis=1)
        # Reduce only to per-(sublane, lane) partials: pure vreg adds, no XLU.
        sq = sq + jnp.sum((d * d).reshape(-1, SUBLANE, LANE), axis=0)
        dsq = dsq + jnp.sum((dd * dd).reshape(-1, SUBLANE, LANE), axis=0)
        return sq, dsq

    zero = jnp.zeros((SUBLANE, LANE), jnp.float32)
    sq, dsq = jax.lax.fori_loop(0, tile_rows // CHUNK_ROWS, chunk_body, (zero, zero))
    acc_sq_ref[...] += sq
    acc_dd_ref[...] += dsq

    @pl.when(i == pl.num_programs(0) - 1)
    def _finalize():
        # C divides 128 here, so coefficient index = lane % C for every frame.
        coef = jax.lax.broadcasted_iota(jnp.int32, (SUBLANE, LANE), 1) % C
        sq_acc = acc_sq_ref[...]
        dd_acc = acc_dd_ref[...]
        direct = jnp.sum(sq_acc) * inv_direct
        first = jnp.sum(jnp.where(coef < 13, sq_acc, 0.0)) * two_inv_first
        temporal = jnp.sum(jnp.where(coef >= 1, dd_acc, 0.0)) * inv_temporal
        out_ref[...] = jnp.full((1, LANE), direct + first + temporal, jnp.float32)


def _loss_lane_dense(pred, target, B, T, C):
    rows = (B * T * C) // LANE
    tile_rows = min(MAX_TILE_ROWS,
                    _round_up(pl.cdiv(rows, MIN_STEPS), CHUNK_ROWS))
    steps = pl.cdiv(rows, tile_rows)
    need_row_mask = (rows % tile_rows) != 0

    p2 = pred.reshape(rows, LANE)     # free reshape: no pad, no extra HBM pass
    t2 = target.reshape(rows, LANE)

    kernel = functools.partial(
        _lane_dense_kernel,
        C=C, rows=rows, tile_rows=tile_rows, need_row_mask=need_row_mask,
        inv_direct=1.0 / (B * T * C),
        two_inv_first=2.0 / (B * T * min(13, C)),
        inv_temporal=1.0 / (B * T * (C - 1)))

    in_spec = pl.BlockSpec((tile_rows, LANE), lambda i: (i, 0))
    itemsize = jnp.dtype(pred.dtype).itemsize
    out = pl.pallas_call(
        kernel,
        out_shape=jax.ShapeDtypeStruct((1, LANE), jnp.float32),
        grid_spec=pltpu.PrefetchScalarGridSpec(
            num_scalar_prefetch=0,
            grid=(steps,),
            in_specs=[in_spec, in_spec],
            out_specs=pl.BlockSpec((1, LANE), lambda i: (0, 0)),
            scratch_shapes=[pltpu.VMEM((SUBLANE, LANE), jnp.float32),
                            pltpu.VMEM((SUBLANE, LANE), jnp.float32)]),
        compiler_params=pltpu.CompilerParams(
            dimension_semantics=("arbitrary",),
            vmem_limit_bytes=VMEM_LIMIT_BYTES),
        cost_estimate=pl.CostEstimate(
            flops=10 * rows * LANE, transcendentals=0,
            bytes_accessed=2 * rows * LANE * itemsize + LANE * 4),
    )(p2, t2)
    return out[0, 0]


# --------------------------------------------------------------------------- #
# Zero-copy fallback path: any C (block last dim = full C, contiguous DMA).    #
# --------------------------------------------------------------------------- #
def _frame_kernel(p_ref, t_ref, out_ref, acc_sq_ref, acc_dd_ref, *,
                  C, F, tile_f, need_row_mask,
                  inv_direct, two_inv_first, inv_temporal):
    i = pl.program_id(0)

    @pl.when(i == 0)
    def _init():
        acc_sq_ref[...] = jnp.zeros_like(acc_sq_ref)
        acc_dd_ref[...] = jnp.zeros_like(acc_dd_ref)

    d = p_ref[...].astype(jnp.float32) - t_ref[...].astype(jnp.float32)
    if need_row_mask:
        row_id = i * tile_f + jax.lax.broadcasted_iota(jnp.int32, (tile_f, C), 0)
        d = jnp.where(row_id < F, d, 0.0)

    dd = d[:, 1:] - d[:, :-1]
    acc_sq_ref[...] += jnp.sum(d * d, axis=0, keepdims=True)
    acc_dd_ref[...] += jnp.sum(dd * dd, axis=0, keepdims=True)

    @pl.when(i == pl.num_programs(0) - 1)
    def _finalize():
        coef = jax.lax.broadcasted_iota(jnp.int32, (1, C), 1)
        sq_acc = acc_sq_ref[...]
        direct = jnp.sum(sq_acc) * inv_direct
        first = jnp.sum(jnp.where(coef < 13, sq_acc, 0.0)) * two_inv_first
        temporal = jnp.sum(acc_dd_ref[...]) * inv_temporal
        out_ref[...] = jnp.full((1, LANE), direct + first + temporal, jnp.float32)


def _loss_frames(pred, target, B, T, C):
    F = B * T
    c_padded = _round_up(C, LANE)                       # lanes occupied in VMEM
    bytes_cap = max(SUBLANE, (2 * 1024 * 1024 // (c_padded * 4)) // SUBLANE * SUBLANE)
    tile_f = min(MAX_TILE_FRAMES, bytes_cap,
                 max(SUBLANE, _round_up(pl.cdiv(F, MIN_STEPS), SUBLANE)))
    steps = pl.cdiv(F, tile_f)
    need_row_mask = (F % tile_f) != 0

    p2 = pred.reshape(F, C)                             # free reshape, no copy
    t2 = target.reshape(F, C)

    kernel = functools.partial(
        _frame_kernel,
        C=C, F=F, tile_f=tile_f, need_row_mask=need_row_mask,
        inv_direct=1.0 / (F * C),
        two_inv_first=2.0 / (F * min(13, C)),
        inv_temporal=1.0 / (F * (C - 1)))

    in_spec = pl.BlockSpec((tile_f, C), lambda i: (i, 0))
    itemsize = jnp.dtype(pred.dtype).itemsize
    out = pl.pallas_call(
        kernel,
        out_shape=jax.ShapeDtypeStruct((1, LANE), jnp.float32),
        grid_spec=pltpu.PrefetchScalarGridSpec(
            num_scalar_prefetch=0,
            grid=(steps,),
            in_specs=[in_spec, in_spec],
            out_specs=pl.BlockSpec((1, LANE), lambda i: (0, 0)),
            scratch_shapes=[pltpu.VMEM((1, C), jnp.float32),
                            pltpu.VMEM((1, C - 1), jnp.float32)]),
        compiler_params=pltpu.CompilerParams(
            dimension_semantics=("arbitrary",),
            vmem_limit_bytes=VMEM_LIMIT_BYTES),
        cost_estimate=pl.CostEstimate(
            flops=10 * F * C, transcendentals=0,
            bytes_accessed=2 * F * C * itemsize + LANE * 4),
    )(p2, t2)
    return out[0, 0]


def cepstral_loss(pred, target):
    assert pred.shape == target.shape and pred.ndim == 3
    B, T, C = pred.shape
    if C < 2:
        raise ValueError("CepstralLoss needs at least 2 cepstral coefficients")
    n = B * T * C
    if LANE % C == 0 and n % LANE == 0:
        return _loss_lane_dense(pred, target, B, T, C)
    # TODO(synk): when C does not divide 128 and the loss runs every training step,
    # pre-pack the tensors once (amortized) into the lane-dense layout instead of
    # streaming C/128-utilized lanes; kept zero-copy here per the fallback design.
    return _loss_frames(pred, target, B, T, C)


def cepstral_loss_ref(pred, target):
    mse = lambda a, b: jnp.mean((a - b) ** 2)
    direct = mse(pred, target)
    first = mse(pred[:, :, :13], target[:, :, :13]) * 2.0
    temporal = mse(pred[:, :, 1:] - pred[:, :, :-1],
                   target[:, :, 1:] - target[:, :, :-1])
    return direct + first + temporal


if __name__ == "__main__":
    key = jax.random.PRNGKey(0)
    k1, k2, k3, k4 = jax.random.split(key, 4)

    # Lane-dense path (C divides 128, B*T*C % 128 == 0).
    B, T, C = 2, 8, 32
    pred = jax.random.normal(k1, (B, T, C), dtype=jnp.float32)
    target = jax.random.normal(k2, (B, T, C), dtype=jnp.float32)
    loss = jax.jit(cepstral_loss)(pred, target)
    jax.block_until_ready(loss)
    ref = cepstral_loss_ref(pred, target)
    assert jnp.allclose(loss, ref, rtol=1e-5, atol=1e-5), (float(loss), float(ref))

    # Zero-copy fallback path (C does not divide 128).
    B2, T2, C2 = 2, 8, 20
    pred2 = jax.random.normal(k3, (B2, T2, C2), dtype=jnp.float32)
    target2 = jax.random.normal(k4, (B2, T2, C2), dtype=jnp.float32)
    loss2 = jax.jit(cepstral_loss)(pred2, target2)
    jax.block_until_ready(loss2)
    ref2 = cepstral_loss_ref(pred2, target2)
    assert jnp.allclose(loss2, ref2, rtol=1e-5, atol=1e-5), (float(loss2), float(ref2))

    print("KERNEL_OK")
</pallas_src>

<mosaic_0001>
module attributes {stable_mosaic.version = 11 : i64} {
  func.func @_lane_dense_kernel(%arg0: i32, %arg1: memref<512x128xf32, #tpu.memory_space<vmem>>, %arg2: memref<512x128xf32, #tpu.memory_space<vmem>>, %arg3: memref<1x128xf32, #tpu.memory_space<vmem>>, %arg4: memref<8x128xf32, #tpu.memory_space<vmem>>, %arg5: memref<8x128xf32, #tpu.memory_space<vmem>>) attributes {dimension_semantics = [#tpu.dimension_semantics<arbitrary>], iteration_bounds = array<i64: 1>, scalar_prefetch = 0 : i64, scratch_operands = 2 : i64, tpu.core_type = #tpu.core_type<tc>, window_params = [{transform_indices = @transform_0, window_bounds = array<i64: 512, 128>}, {transform_indices = @transform_1, window_bounds = array<i64: 512, 128>}, {pipeline_mode = #tpu.pipeline_mode<synchronous>, transform_indices = @transform_2, window_bounds = array<i64: 1, 128>}]} {
    %c0_i32 = arith.constant 0 : i32
    %0 = arith.cmpi eq, %arg0, %c0_i32 : i32
    %1 = arith.extui %0 : i1 to i32
    %c0_i32_0 = arith.constant 0 : i32
    %2 = arith.cmpi ne, %1, %c0_i32_0 : i32
    scf.if %2 {
      %cst_18 = arith.constant 0.000000e+00 : f32
      %39 = vector.broadcast %cst_18 : f32 to vector<8x128xf32>
      %c0_19 = arith.constant 0 : index
      %c0_20 = arith.constant 0 : index
      %40 = vector.load %arg4[%c0_19, %c0_20] : memref<8x128xf32, #tpu.memory_space<vmem>>, vector<8x128xf32>
      tpu.vector_store %arg4[%c0_19, %c0_20], %39 {strides = array<i32>} : memref<8x128xf32, #tpu.memory_space<vmem>>, vector<8x128xf32>,
      %cst_21 = arith.constant 0.000000e+00 : f32
      %41 = vector.broadcast %cst_21 : f32 to vector<8x128xf32>
      %c0_22 = arith.constant 0 : index
      %c0_23 = arith.constant 0 : index
      %42 = vector.load %arg5[%c0_22, %c0_23] : memref<8x128xf32, #tpu.memory_space<vmem>>, vector<8x128xf32>
      tpu.vector_store %arg5[%c0_22, %c0_23], %41 {strides = array<i32>} : memref<8x128xf32, #tpu.memory_space<vmem>>, vector<8x128xf32>,
    } else {
    }
    %cst = arith.constant 0.000000e+00 : f32
    %3 = vector.broadcast %cst : f32 to vector<8x128xf32>
    %c0_i32_1 = arith.constant 0 : i32
    %c512_i32 = arith.constant 512 : i32
    %4 = arith.muli %c0_i32_1, %c512_i32 : i32
    %5 = tpu.assume_multiple %4, 512 : i32
    %6 = arith.index_cast %5 : i32 to index
    %c0 = arith.constant 0 : index
    %7 = vector.load %arg1[%6, %c0] : memref<512x128xf32, #tpu.memory_space<vmem>>, vector<512x128xf32>
    %8 = arith.index_cast %5 : i32 to index
    %c0_2 = arith.constant 0 : index
    %9 = vector.load %arg2[%8, %c0_2] : memref<512x128xf32, #tpu.memory_space<vmem>>, vector<512x128xf32>
    %10 = arith.subf %7, %9 : vector<512x128xf32>
    %c512_i32_3 = arith.constant 512 : i32
    %11 = arith.muli %arg0, %c512_i32_3 : i32
    %12 = arith.addi %11, %5 : i32
    %13 = tpu.iota {dimensions = array<i32: 0>} : vector<512x128xi32>
    %14 = vector.broadcast %12 : i32 to vector<512x128xi32>
    %15 = arith.addi %14, %13 : vector<512x128xi32>
    %c4_i32 = arith.constant 4 : i32
    %16 = vector.broadcast %c4_i32 : i32 to vector<512x128xi32>
    %17 = arith.cmpi slt, %15, %16 : vector<512x128xi32>
    %cst_4 = arith.constant 0.000000e+00 : f32
    %18 = vector.broadcast %cst_4 : f32 to vector<512x128xf32>
    %19 = arith.select %17, %10, %18 : vector<512x128xi1>, vector<512x128xf32>
    %c1_i32 = arith.constant 1 : i32
    %20 = tpu.dynamic_rotate %19 by %c1_i32 dim 1 : vector<512x128xf32>, i32 -> vector<512x128xf32>
    %21 = arith.subf %19, %20 : vector<512x128xf32>
    %22 = arith.mulf %19, %19 : vector<512x128xf32>
    %23 = vector.shape_cast %22 : vector<512x128xf32> to vector<64x8x128xf32>
    %cst_5 = arith.constant dense<0.000000e+00> : vector<8x128xf32>
    %24 = vector.multi_reduction <add>, %23, %cst_5 [0] : vector<64x8x128xf32> to vector<8x128xf32>
    %25 = arith.addf %3, %24 : vector<8x128xf32>
    %26 = arith.mulf %21, %21 : vector<512x128xf32>
    %27 = vector.shape_cast %26 : vector<512x128xf32> to vector<64x8x128xf32>
    %cst_6 = arith.constant dense<0.000000e+00> : vector<8x128xf32>
    %28 = vector.multi_reduction <add>, %27, %cst_6 [0] : vector<64x8x128xf32> to vector<8x128xf32>
    %29 = arith.addf %3, %28 : vector<8x128xf32>
    %c1_i32_7 = arith.constant 1 : i32
    %c0_8 = arith.constant 0 : index
    %c0_9 = arith.constant 0 : index
    %30 = vector.load %arg4[%c0_8, %c0_9] : memref<8x128xf32, #tpu.memory_space<vmem>>, vector<8x128xf32>
    %31 = arith.addf %30, %25 : vector<8x128xf32>
    %c0_10 = arith.constant 0 : index
    %c0_11 = arith.constant 0 : index
    %32 = vector.load %arg4[%c0_10, %c0_11] : memref<8x128xf32, #tpu.memory_space<vmem>>, vector<8x128xf32>
    tpu.vector_store %arg4[%c0_10, %c0_11], %31 {strides = array<i32>} : memref<8x128xf32, #tpu.memory_space<vmem>>, vector<8x128xf32>,
    %c0_12 = arith.constant 0 : index
    %c0_13 = arith.constant 0 : index
    %33 = vector.load %arg5[%c0_12, %c0_13] : memref<8x128xf32, #tpu.memory_space<vmem>>, vector<8x128xf32>
    %34 = arith.addf %33, %29 : vector<8x128xf32>
    %c0_14 = arith.constant 0 : index
    %c0_15 = arith.constant 0 : index
    %35 = vector.load %arg5[%c0_14, %c0_15] : memref<8x128xf32, #tpu.memory_space<vmem>>, vector<8x128xf32>
    tpu.vector_store %arg5[%c0_14, %c0_15], %34 {strides = array<i32>} : memref<8x128xf32, #tpu.memory_space<vmem>>, vector<8x128xf32>,
    %c0_i32_16 = arith.constant 0 : i32
    %36 = arith.cmpi eq, %arg0, %c0_i32_16 : i32
    %37 = arith.extui %36 : i1 to i32
    %c0_i32_17 = arith.constant 0 : i32
    %38 = arith.cmpi ne, %37, %c0_i32_17 : i32
    scf.if %38 {
      %39 = tpu.iota {dimensions = array<i32: 1>} : vector<8x128xi32>
      %c32_i32 = arith.constant 32 : i32
      %c0_i32_18 = arith.constant 0 : i32
      %40 = arith.cmpi eq, %c32_i32, %c0_i32_18 : i32
      %c1_i32_19 = arith.constant 1 : i32
      %41 = arith.select %40, %c1_i32_19, %c32_i32 : i32
      %42 = vector.broadcast %41 : i32 to vector<8x128xi32>
      %43 = arith.remsi %39, %42 : vector<8x128xi32>
      %c0_i32_20 = arith.constant 0 : i32
      %44 = vector.broadcast %c0_i32_20 : i32 to vector<8x128xi32>
      %45 = arith.cmpi ne, %43, %44 : vector<8x128xi32>
      %c0_i32_21 = arith.constant 0 : i32
      %46 = vector.broadcast %c0_i32_21 : i32 to vector<8x128xi32>
      %47 = arith.cmpi slt, %43, %46 : vector<8x128xi32>
      %c0_i32_22 = arith.constant 0 : i32
      %48 = arith.cmpi slt, %41, %c0_i32_22 : i32
      %49 = vector.broadcast %48 : i1 to vector<8x128xi1>
      %50 = vector.broadcast %49 : vector<8x128xi1> to vector<8x128xi1>
      %51 = arith.xori %47, %50 : vector<8x128xi1>
      %52 = arith.andi %51, %45 : vector<8x128xi1>
      %53 = vector.broadcast %41 : i32 to vector<8x128xi32>
      %54 = arith.addi %43, %53 : vector<8x128xi32>
      %55 = arith.select %52, %54, %43 : vector<8x128xi1>, vector<8x128xi32>
      %c0_23 = arith.constant 0 : index
      %c0_24 = arith.constant 0 : index
      %56 = vector.load %arg4[%c0_23, %c0_24] : memref<8x128xf32, #tpu.memory_space<vmem>>, vector<8x128xf32>
      %c0_25 = arith.constant 0 : index
      %c0_26 = arith.constant 0 : index
      %57 = vector.load %arg5[%c0_25, %c0_26] : memref<8x128xf32, #tpu.memory_space<vmem>>, vector<8x128xf32>
      %58 = vector.shape_cast %56 : vector<8x128xf32> to vector<1x8x128xf32>
      %cst_27 = arith.constant dense<0.000000e+00> : vector<1xf32>
      %59 = vector.multi_reduction <add>, %58, %cst_27 [1, 2] : vector<1x8x128xf32> to vector<1xf32>
      %60 = vector.shape_cast %59 : vector<1xf32> to vector<1x1x1xf32>
      %61 = vector.extract %60[0, 0, 0] : f32 from vector<1x1x1xf32>
      %cst_28 = arith.constant 0.001953125 : f32
      %62 = arith.mulf %61, %cst_28 : f32
      %c13_i32 = arith.constant 13 : i32
      %63 = vector.broadcast %c13_i32 : i32 to vector<8x128xi32>
      %64 = arith.cmpi slt, %55, %63 : vector<8x128xi32>
      %cst_29 = arith.constant 0.000000e+00 : f32
      %65 = vector.broadcast %cst_29 : f32 to vector<8x128xf32>
      %66 = arith.select %64, %56, %65 : vector<8x128xi1>, vector<8x128xf32>
      %67 = vector.shape_cast %66 : vector<8x128xf32> to vector<1x8x128xf32>
      %cst_30 = arith.constant dense<0.000000e+00> : vector<1xf32>
      %68 = vector.multi_reduction <add>, %67, %cst_30 [1, 2] : vector<1x8x128xf32> to vector<1xf32>
      %69 = vector.shape_cast %68 : vector<1xf32> to vector<1x1x1xf32>
      %70 = vector.extract %69[0, 0, 0] : f32 from vector<1x1x1xf32>
      %cst_31 = arith.constant 0.00961538497 : f32
      %71 = arith.mulf %70, %cst_31 : f32
      %c1_i32_32 = arith.constant 1 : i32
      %72 = vector.broadcast %c1_i32_32 : i32 to vector<8x128xi32>
      %73 = arith.cmpi sge, %55, %72 : vector<8x128xi32>
      %cst_33 = arith.constant 0.000000e+00 : f32
      %74 = vector.broadcast %cst_33 : f32 to vector<8x128xf32>
      %75 = arith.select %73, %57, %74 : vector<8x128xi1>, vector<8x128xf32>
      %76 = vector.shape_cast %75 : vector<8x128xf32> to vector<1x8x128xf32>
      %cst_34 = arith.constant dense<0.000000e+00> : vector<1xf32>
      %77 = vector.multi_reduction <add>, %76, %cst_34 [1, 2] : vector<1x8x128xf32> to vector<1xf32>
      %78 = vector.shape_cast %77 : vector<1xf32> to vector<1x1x1xf32>
      %79 = vector.extract %78[0, 0, 0] : f32 from vector<1x1x1xf32>
      %cst_35 = arith.constant 0.00201612897 : f32
      %80 = arith.mulf %79, %cst_35 : f32
      %81 = arith.addf %62, %71 : f32
      %82 = arith.addf %81, %80 : f32
      %83 = vector.broadcast %82 : f32 to vector<1x128xf32>
      %c0_36 = arith.constant 0 : index
      %c0_37 = arith.constant 0 : index
      %84 = vector.load %arg3[%c0_36, %c0_37] : memref<1x128xf32, #tpu.memory_space<vmem>>, vector<1x128xf32>
      tpu.vector_store %arg3[%c0_36, %c0_37], %83 {strides = array<i32>} : memref<1x128xf32, #tpu.memory_space<vmem>>, vector<1x128xf32>,
    } else {
    }
    return
  }
  func.func @transform_0(%arg0: i32) -> (i32, i32) {
    %c0_i32 = arith.constant 0 : i32
    %c0_i32_0 = arith.constant 0 : i32
    return %arg0, %c0_i32 : i32, i32
  }
  func.func @transform_1(%arg0: i32) -> (i32, i32) {
    %c0_i32 = arith.constant 0 : i32
    %c0_i32_0 = arith.constant 0 : i32
    return %arg0, %c0_i32 : i32, i32
  }
  func.func @transform_2(%arg0: i32) -> (i32, i32) {
    %c0_i32 = arith.constant 0 : i32
    %c0_i32_0 = arith.constant 0 : i32
    %c0_i32_1 = arith.constant 0 : i32
    return %c0_i32, %c0_i32_0 : i32, i32
  }
}

</mosaic_0001>

<bundles_post_ra>
// kernel: cepstral_loss.1
= control target key start
LH: loop header
LB: loop body
LE: loop exit
PB: predicated region body
PF: predicated region fallthrough
CT: control target
= control target key end

     0   :  { %v212_v2 = vlaneseq  ;;  %s1212_s0 = inlined_call_operand.vmem [shape: f32[4,128], index: 0, kind: input, shape index: {}]   ;;  %s1213_s1 = inlined_call_operand.vmem [shape: f32[4,128], index: 1, kind: input, shape index: {}]   ;;  %s1214_s2 = inlined_call_operand.hbm [shape: f32[1,128], index: 2, kind: output, shape index: {}]  }
   0x1   :  { %v18_v0 = vld [vmem:[%s1212_s0] sm:$0xff] }
   0x2   :  { %v82_v1 = vld [vmem:[%s1213_s1] sm:$0xff] }
   0x3   :  { %7 = vsyncpa [#allocation5], 0  ;;  %v146_v3 = vsub.f32 %v18_v0, %v82_v1  ;;  %v1028_v4 = vmov 0.0   ;;  %s1029_s13 = smov 1   ;;  %v213_v5 = vshrl.u32 %v212_v2, 7  ;;  %v1185_v60 = vand.u32 127, %v212_v2 }
   0x4   :  { %474 = vrot.lane.b32.xlu1 %v1028_v4, %s1029_s13  ;;  %s1030_s17 = smov [#allocation4]  }
   0x5   :  { %vm342_vm0 = vcmp.lt.s32.totalorder %v213_v5, 4  ;;  %s987_s18 = sshll.u32 %s1030_s17, 4  ;;  %s988_s18 = int_to_ptr.vmem [resolvable:$true] %s987_s18 }
   0x6   :  { %v1055_v6 = vsel %vm342_vm0, %v146_v3, 0.0  ;;  %s1004_s22 = scalar_lea.vmem %s988_s18, 16  ;;  %s1008_s23 = scalar_lea.vmem %s988_s18, 32 }
   0x7   :  { %470 = vrot.lane.b32.xlu0 %v1055_v6, %s1029_s13  ;;  %p1005_p0 = scmp.ne.s32.totalorder %s988_s18, %s1004_s22  ;;  %p1009_p1 = scmp.lt.s32.totalorder %s988_s18, %s988_s18 }
   0x8   :  { %476 = vrot.lane.b32.xlu1 %v1028_v4, %s1029_s13  ;;  %p1010_p2 = scmp.lt.s32.totalorder %s1008_s23, %s1004_s22 }
   0xa   :  { %p1011_p3 = por %p1010_p2, %p1009_p1 }
   0xb   :  { %472 = vrot.lane.b32.xlu0 %v1028_v4, %s1029_s13 }
   0xc   :  { %480 = vrot.lane.b32.xlu1 %v1028_v4, %s1029_s13  ;;  %p1012_p4 = pnand %p1011_p3, %p1005_p0 }
   0xf   :  { %478 = vrot.lane.b32.xlu0 %v1028_v4, %s1029_s13 }
  0x10   :  { %484 = vrot.lane.b32.xlu1 %v1028_v4, %s1029_s13 }
  0x13   :  { %482 = vrot.lane.b32.xlu0 %v1028_v4, %s1029_s13 }
  0x14   :  { %488 = vrot.lane.b32.xlu1 %v1028_v4, %s1029_s13 }
  0x17   :  { %486 = vrot.lane.b32.xlu0 %v1028_v4, %s1029_s13 }
  0x18   :  { %492 = vrot.lane.b32.xlu1 %v1028_v4, %s1029_s13 }
  0x1b   :  { %490 = vrot.lane.b32.xlu0 %v1028_v4, %s1029_s13 }
  0x1c   :  { %496 = vrot.lane.b32.xlu1 %v1028_v4, %s1029_s13 }
  0x1f   :  { %494 = vrot.lane.b32.xlu0 %v1028_v4, %s1029_s13 }
  0x20   :  { %500 = vrot.lane.b32.xlu1 %v1028_v4, %s1029_s13 }
  0x23   :  { %498 = vrot.lane.b32.xlu0 %v1028_v4, %s1029_s13 }
  0x24   :  { %504 = vrot.lane.b32.xlu1 %v1028_v4, %s1029_s13 }
  0x27   :  { %502 = vrot.lane.b32.xlu0 %v1028_v4, %s1029_s13 }
  0x28   :  { %508 = vrot.lane.b32.xlu1 %v1028_v4, %s1029_s13 }
  0x2b   :  { %506 = vrot.lane.b32.xlu0 %v1028_v4, %s1029_s13 }
  0x2c   :  { %512 = vrot.lane.b32.xlu1 %v1028_v4, %s1029_s13 }
  0x2f   :  { %510 = vrot.lane.b32.xlu0 %v1028_v4, %s1029_s13 }
  0x30   :  { %516 = vrot.lane.b32.xlu1 %v1028_v4, %s1029_s13 }
  0x33   :  { %514 = vrot.lane.b32.xlu0 %v1028_v4, %s1029_s13 }
  0x34   :  { %520 = vrot.lane.b32.xlu1 %v1028_v4, %s1029_s13 }
  0x37   :  { %518 = vrot.lane.b32.xlu0 %v1028_v4, %s1029_s13 }
  0x38   :  { %524 = vrot.lane.b32.xlu1 %v1028_v4, %s1029_s13 }
  0x3b   :  { %522 = vrot.lane.b32.xlu0 %v1028_v4, %s1029_s13 }
  0x3c   :  { %528 = vrot.lane.b32.xlu1 %v1028_v4, %s1029_s13 }
  0x3f   :  { %526 = vrot.lane.b32.xlu0 %v1028_v4, %s1029_s13 }
  0x40   :  { %532 = vrot.lane.b32.xlu1 %v1028_v4, %s1029_s13 }
  0x43   :  { %530 = vrot.lane.b32.xlu0 %v1028_v4, %s1029_s13 }
  0x44   :  { %536 = vrot.lane.b32.xlu1 %v1028_v4, %s1029_s13 }
  0x47   :  { %534 = vrot.lane.b32.xlu0 %v1028_v4, %s1029_s13 }
  0x48   :  { %540 = vrot.lane.b32.xlu1 %v1028_v4, %s1029_s13 }
  0x4b   :  { %538 = vrot.lane.b32.xlu0 %v1028_v4, %s1029_s13 }
  0x4c   :  { %544 = vrot.lane.b32.xlu1 %v1028_v4, %s1029_s13 }
  0x4f   :  { %542 = vrot.lane.b32.xlu0 %v1028_v4, %s1029_s13 }
  0x50   :  { %548 = vrot.lane.b32.xlu1 %v1028_v4, %s1029_s13 }
  0x53   :  { %546 = vrot.lane.b32.xlu0 %v1028_v4, %s1029_s13 }
  0x54   :  { %552 = vrot.lane.b32.xlu1 %v1028_v4, %s1029_s13 }
  0x57   :  { %550 = vrot.lane.b32.xlu0 %v1028_v4, %s1029_s13 }
  0x58   :  { %556 = vrot.lane.b32.xlu1 %v1028_v4, %s1029_s13 }
  0x5b   :  { %554 = vrot.lane.b32.xlu0 %v1028_v4, %s1029_s13 }
  0x5c   :  { %560 = vrot.lane.b32.xlu1 %v1028_v4, %s1029_s13 }
  0x5f   :  { %558 = vrot.lane.b32.xlu0 %v1028_v4, %s1029_s13 }
  0x60   :  { %564 = vrot.lane.b32.xlu1 %v1028_v4, %s1029_s13 }
  0x63   :  { %562 = vrot.lane.b32.xlu0 %v1028_v4, %s1029_s13 }
  0x64   :  { %568 = vrot.lane.b32.xlu1 %v1028_v4, %s1029_s13 }
  0x67   :  { %566 = vrot.lane.b32.xlu0 %v1028_v4, %s1029_s13 }
  0x68   :  { %572 = vrot.lane.b32.xlu1 %v1028_v4, %s1029_s13 }
  0x6b   :  { %570 = vrot.lane.b32.xlu0 %v1028_v4, %s1029_s13 }
  0x6c   :  { %576 = vrot.lane.b32.xlu1 %v1028_v4, %s1029_s13 }
  0x6f   :  { %574 = vrot.lane.b32.xlu0 %v1028_v4, %s1029_s13 }
  0x70   :  { %580 = vrot.lane.b32.xlu1 %v1028_v4, %s1029_s13 }
  0x73   :  { %578 = vrot.lane.b32.xlu0 %v1028_v4, %s1029_s13 }
  0x74   :  { %584 = vrot.lane.b32.xlu1 %v1028_v4, %s1029_s13 }
  0x76   :  { %v475_v7 = vpop.permute.xlu1 %474 }
  0x77   :  { %582 = vrot.lane.b32.xlu0 %v1028_v4, %s1029_s13  ;;  %v600_v12 = vsub.f32 0.0, %v475_v7  ;;  %v933_v7 = vand.u32 31, %v1185_v60 }
  0x78   :  { %588 = vrot.lane.b32.xlu1 %v1028_v4, %s1029_s13 }
  0x79   :  { %v471_v9 = vpop.permute.xlu0 %470  ;;  %v792_v19 = vmul.f32 %v600_v12, %v600_v12  ;;  %vm1192_vm1 = vcmp.lt.s32.totalorder %v933_v7, 13  ;;  %vm965_vm2 = vcmp.ge.s32.totalorder %v933_v7, 1 }
  0x7a   :  { %v477_v8 = vpop.permute.xlu1 %476  ;;  %v598_v10 = vsub.f32 %v1055_v6, %v471_v9 }
  0x7b   :  { %586 = vrot.lane.b32.xlu0 %v1028_v4, %s1029_s13  ;;  %v601_v15 = vsub.f32 0.0, %v477_v8 }
  0x7c   :  { %592 = vrot.lane.b32.xlu1 %v1028_v4, %s1029_s13  ;;  %v790_v16 = vmul.f32 %v598_v10, %v598_v10 }
  0x7d   :  { %v473_v13 = vpop.permute.xlu0 %472  ;;  %v793_v22 = vmul.f32 %v601_v15, %v601_v15 }
  0x7e   :  { %v481_v11 = vpop.permute.xlu1 %480  ;;  %v599_v14 = vsub.f32 0.0, %v473_v13  ;;  %v662_v13 = vmul.f32 %v1055_v6, %v1055_v6 }
  0x7f   :  { %590 = vrot.lane.b32.xlu0 %v1028_v4, %s1029_s13  ;;  %v603_v24 = vsub.f32 0.0, %v481_v11 }
  0x80   :  { %596 = vrot.lane.b32.xlu1 %v1028_v4, %s1029_s13  ;;  %v791_v17 = vmul.f32 %v599_v14, %v599_v14 }
  0x81   :  { %v479_v20 = vpop.permute.xlu0 %478  ;;  %v795_v30 = vmul.f32 %v603_v24, %v603_v24 }
  0x82   :  { %v485_v18 = vpop.permute.xlu1 %484  ;;  %v854_v21 = vadd.f32 %v791_v17, %v790_v16  ;;  %v602_v23 = vsub.f32 0.0, %v479_v20 }
  0x83   :  { %594 = vrot.lane.b32.xlu0 %v1028_v4, %s1029_s13  ;;  %v605_v32 = vsub.f32 0.0, %v485_v18 }
  0x84   :  { %v855_v25 = vadd.f32 %v854_v21, %v792_v19  ;;  %v794_v26 = vmul.f32 %v602_v23, %v602_v23 }
  0x85   :  { %v483_v28 = vpop.permute.xlu0 %482  ;;  %v797_v38 = vmul.f32 %v605_v32, %v605_v32 }
  0x86   :  { %v489_v27 = vpop.permute.xlu1 %488  ;;  %v856_v29 = vadd.f32 %v855_v25, %v793_v22  ;;  %v604_v31 = vsub.f32 0.0, %v483_v28  ;;  %v954_v22 = vsel %vm1192_vm1, %v662_v13, 0.0 }
  0x87   :  { %v607_v40 = vsub.f32 0.0, %v489_v27 }
  0x88   :  { %v857_v33 = vadd.f32 %v856_v29, %v794_v26  ;;  %v796_v34 = vmul.f32 %v604_v31, %v604_v31 }
  0x89   :  { %v487_v36 = vpop.permute.xlu0 %486  ;;  %v799_v46 = vmul.f32 %v607_v40, %v607_v40 }
  0x8a   :  { %v493_v35 = vpop.permute.xlu1 %492  ;;  %v858_v37 = vadd.f32 %v857_v33, %v795_v30  ;;  %v606_v39 = vsub.f32 0.0, %v487_v36 }
  0x8b   :  { %v609_v48 = vsub.f32 0.0, %v493_v35 }
  0x8c   :  { %v859_v41 = vadd.f32 %v858_v37, %v796_v34  ;;  %v798_v42 = vmul.f32 %v606_v39, %v606_v39 }
  0x8d   :  { %v491_v44 = vpop.permute.xlu0 %490  ;;  %v801_v54 = vmul.f32 %v609_v48, %v609_v48 }
  0x8e   :  { %v497_v43 = vpop.permute.xlu1 %496  ;;  %v860_v45 = vadd.f32 %v859_v41, %v797_v38  ;;  %v608_v47 = vsub.f32 0.0, %v491_v44 }
  0x8f   :  { %v611_v56 = vsub.f32 0.0, %v497_v43 }
  0x90   :  { %v861_v49 = vadd.f32 %v860_v45, %v798_v42  ;;  %v800_v50 = vmul.f32 %v608_v47, %v608_v47 }
  0x91   :  { %v495_v52 = vpop.permute.xlu0 %494  ;;  %v803_v63 = vmul.f32 %v611_v56, %v611_v56 }
  0x92   :  { %v501_v51 = vpop.permute.xlu1 %500  ;;  %v862_v53 = vadd.f32 %v861_v49, %v799_v46  ;;  %v610_v55 = vsub.f32 0.0, %v495_v52 }
  0x93   :  { %v613_v1 = vsub.f32 0.0, %v501_v51 }
  0x94   :  { %v863_v57 = vadd.f32 %v862_v53, %v800_v50  ;;  %v802_v58 = vmul.f32 %v610_v55, %v610_v55 }
  0x95   :  { %v499_v61 = vpop.permute.xlu0 %498  ;;  %v805_v10 = vmul.f32 %v613_v1, %v613_v1 }
  0x96   :  { %v505_v59 = vpop.permute.xlu1 %504  ;;  %v864_v62 = vadd.f32 %v863_v57, %v801_v54  ;;  %v612_v0 = vsub.f32 0.0, %v499_v61 }
  0x97   :  { %v615_v12 = vsub.f32 0.0, %v505_v59 }
  0x98   :  { %v865_v3 = vadd.f32 %v864_v62, %v802_v58  ;;  %v804_v4 = vmul.f32 %v612_v0, %v612_v0 }
  0x99   :  { %v503_v8 = vpop.permute.xlu0 %502  ;;  %v807_v19 = vmul.f32 %v615_v12, %v615_v12 }
  0x9a   :  { %v509_v5 = vpop.permute.xlu1 %508  ;;  %v866_v9 = vadd.f32 %v865_v3, %v803_v63  ;;  %v614_v11 = vsub.f32 0.0, %v503_v8 }
  0x9b   :  { %v617_v21 = vsub.f32 0.0, %v509_v5 }
  0x9c   :  { %v867_v2 = vadd.f32 %v866_v9, %v804_v4  ;;  %v806_v14 = vmul.f32 %v614_v11, %v614_v11 }
  0x9d   :  { %v507_v17 = vpop.permute.xlu0 %506  ;;  %v809_v27 = vmul.f32 %v617_v21, %v617_v21 }
  0x9e   :  { %v513_v15 = vpop.permute.xlu1 %512  ;;  %v868_v18 = vadd.f32 %v867_v2, %v805_v10  ;;  %v616_v20 = vsub.f32 0.0, %v507_v17 }
  0x9f   :  { %v619_v29 = vsub.f32 0.0, %v513_v15 }
  0xa0   :  { %v869_v23 = vadd.f32 %v868_v18, %v806_v14  ;;  %v808_v24 = vmul.f32 %v616_v20, %v616_v20 }
  0xa1   :  { %v511_v25 = vpop.permute.xlu0 %510  ;;  %v811_v35 = vmul.f32 %v619_v29, %v619_v29 }
  0xa2   :  { %v517_v6 = vpop.permute.xlu1 %516  ;;  %v870_v26 = vadd.f32 %v869_v23, %v807_v19  ;;  %v618_v28 = vsub.f32 0.0, %v511_v25  ;;  %943 = vadd.xlane.f32.xlu0 %v662_v13 }
  0xa3   :  { %v621_v37 = vsub.f32 0.0, %v517_v6 }
  0xa4   :  { %955 = vadd.xlane.f32.xlu1 %v954_v22  ;;  %v871_v30 = vadd.f32 %v870_v26, %v808_v24  ;;  %v810_v31 = vmul.f32 %v618_v28, %v618_v28 }
  0xa5   :  { %v515_v33 = vpop.permute.xlu0 %514  ;;  %v813_v43 = vmul.f32 %v621_v37, %v621_v37 }
  0xa6   :  { %v521_v32 = vpop.permute.xlu1 %520  ;;  %v872_v34 = vadd.f32 %v871_v30, %v809_v27  ;;  %v620_v36 = vsub.f32 0.0, %v515_v33 }
  0xa7   :  { %v623_v45 = vsub.f32 0.0, %v521_v32 }
  0xa8   :  { %v873_v38 = vadd.f32 %v872_v34, %v810_v31  ;;  %v812_v39 = vmul.f32 %v620_v36, %v620_v36 }
  0xa9   :  { %v519_v41 = vpop.permute.xlu0 %518  ;;  %v815_v51 = vmul.f32 %v623_v45, %v623_v45 }
  0xaa   :  { %v525_v40 = vpop.permute.xlu1 %524  ;;  %v874_v42 = vadd.f32 %v873_v38, %v811_v35  ;;  %v622_v44 = vsub.f32 0.0, %v519_v41 }
  0xab   :  { %v625_v53 = vsub.f32 0.0, %v525_v40 }
  0xac   :  { %v875_v46 = vadd.f32 %v874_v42, %v812_v39  ;;  %v814_v47 = vmul.f32 %v622_v44, %v622_v44 }
  0xad   :  { %v523_v49 = vpop.permute.xlu0 %522  ;;  %v817_v59 = vmul.f32 %v625_v53, %v625_v53 }
  0xae   :  { %v529_v48 = vpop.permute.xlu1 %528  ;;  %v876_v50 = vadd.f32 %v875_v46, %v813_v43  ;;  %v624_v52 = vsub.f32 0.0, %v523_v49 }
  0xaf   :  { %v627_v62 = vsub.f32 0.0, %v529_v48 }
  0xb0   :  { %v877_v54 = vadd.f32 %v876_v50, %v814_v47  ;;  %v816_v55 = vmul.f32 %v624_v52, %v624_v52 }
  0xb1   :  { %v527_v57 = vpop.permute.xlu0 %526  ;;  %v819_v5 = vmul.f32 %v627_v62, %v627_v62 }
  0xb2   :  { %v533_v56 = vpop.permute.xlu1 %532  ;;  %v878_v58 = vadd.f32 %v877_v54, %v815_v51  ;;  %v626_v61 = vsub.f32 0.0, %v527_v57 }
  0xb3   :  { %v629_v9 = vsub.f32 0.0, %v533_v56 }
  0xb4   :  { %v879_v63 = vadd.f32 %v878_v58, %v816_v55  ;;  %v818_v0 = vmul.f32 %v626_v61, %v626_v61 }
  0xb5   :  { %v531_v3 = vpop.permute.xlu0 %530  ;;  %v821_v14 = vmul.f32 %v629_v9, %v629_v9 }
  0xb6   :  { %v537_v1 = vpop.permute.xlu1 %536  ;;  %v880_v4 = vadd.f32 %v879_v63, %v817_v59  ;;  %v628_v8 = vsub.f32 0.0, %v531_v3 }
  0xb7   :  { %v631_v16 = vsub.f32 0.0, %v537_v1 }
  0xb8   :  { %v881_v10 = vadd.f32 %v880_v4, %v818_v0  ;;  %v820_v11 = vmul.f32 %v628_v8, %v628_v8 }
  0xb9   :  { %v535_v13 = vpop.permute.xlu0 %534  ;;  %v823_v22 = vmul.f32 %v631_v16, %v631_v16 }
  0xba   :  { %v541_v12 = vpop.permute.xlu1 %540  ;;  %v882_v2 = vadd.f32 %v881_v10, %v819_v5  ;;  %v630_v15 = vsub.f32 0.0, %v535_v13 }
  0xbb   :  { %v633_v24 = vsub.f32 0.0, %v541_v12 }
  0xbc   :  { %v883_v17 = vadd.f32 %v882_v2, %v820_v11  ;;  %v822_v18 = vmul.f32 %v630_v15, %v630_v15 }
  0xbd   :  { %v539_v20 = vpop.permute.xlu0 %538  ;;  %v825_v29 = vmul.f32 %v633_v24, %v633_v24 }
  0xbe   :  { %v545_v19 = vpop.permute.xlu1 %544  ;;  %v884_v21 = vadd.f32 %v883_v17, %v821_v14  ;;  %v632_v23 = vsub.f32 0.0, %v539_v20 }
  0xbf   :  { %v635_v31 = vsub.f32 0.0, %v545_v19 }
  0xc0   :  { %v885_v6 = vadd.f32 %v884_v21, %v822_v18  ;;  %v824_v25 = vmul.f32 %v632_v23, %v632_v23 }
  0xc1   :  { %v543_v27 = vpop.permute.xlu0 %542  ;;  %v827_v37 = vmul.f32 %v635_v31, %v635_v31 }
  0xc2   :  { %v549_v26 = vpop.permute.xlu1 %548  ;;  %v886_v28 = vadd.f32 %v885_v6, %v823_v22  ;;  %v634_v30 = vsub.f32 0.0, %v543_v27 }
  0xc3   :  { %v637_v39 = vsub.f32 0.0, %v549_v26 }
  0xc4   :  { %v887_v32 = vadd.f32 %v886_v28, %v824_v25  ;;  %v826_v33 = vmul.f32 %v634_v30, %v634_v30 }
  0xc5   :  { %v547_v35 = vpop.permute.xlu0 %546  ;;  %v829_v45 = vmul.f32 %v637_v39, %v637_v39 }
  0xc6   :  { %v553_v34 = vpop.permute.xlu1 %552  ;;  %v888_v36 = vadd.f32 %v887_v32, %v825_v29  ;;  %v636_v38 = vsub.f32 0.0, %v547_v35 }
  0xc7   :  { %v639_v47 = vsub.f32 0.0, %v553_v34 }
  0xc8   :  { %v889_v40 = vadd.f32 %v888_v36, %v826_v33  ;;  %v828_v41 = vmul.f32 %v636_v38, %v636_v38 }
  0xc9   :  { %v551_v43 = vpop.permute.xlu0 %550  ;;  %v831_v53 = vmul.f32 %v639_v47, %v639_v47 }
  0xca   :  { %v557_v42 = vpop.permute.xlu1 %556  ;;  %v890_v44 = vadd.f32 %v889_v40, %v827_v37  ;;  %v638_v46 = vsub.f32 0.0, %v551_v43 }
  0xcb   :  { %v641_v55 = vsub.f32 0.0, %v557_v42 }
  0xcc   :  { %v891_v48 = vadd.f32 %v890_v44, %v828_v41  ;;  %v830_v49 = vmul.f32 %v638_v46, %v638_v46 }
  0xcd   :  { %v555_v51 = vpop.permute.xlu0 %554  ;;  %v833_v62 = vmul.f32 %v641_v55, %v641_v55 }
  0xce   :  { %v561_v50 = vpop.permute.xlu1 %560  ;;  %v892_v52 = vadd.f32 %v891_v48, %v829_v45  ;;  %v640_v54 = vsub.f32 0.0, %v555_v51 }
  0xcf   :  { %v643_v0 = vsub.f32 0.0, %v561_v50 }
  0xd0   :  { %v893_v56 = vadd.f32 %v892_v52, %v830_v49  ;;  %v832_v57 = vmul.f32 %v640_v54, %v640_v54 }
  0xd1   :  { %v559_v59 = vpop.permute.xlu0 %558  ;;  %v835_v9 = vmul.f32 %v643_v0, %v643_v0 }
  0xd2   :  { %v565_v58 = vpop.permute.xlu1 %564  ;;  %v894_v61 = vadd.f32 %v893_v56, %v831_v53  ;;  %v642_v63 = vsub.f32 0.0, %v559_v59 }
  0xd3   :  { %v645_v11 = vsub.f32 0.0, %v565_v58 }
  0xd4   :  { %v895_v1 = vadd.f32 %v894_v61, %v832_v57  ;;  %v834_v3 = vmul.f32 %v642_v63, %v642_v63 }
  0xd5   :  { %v563_v5 = vpop.permute.xlu0 %562  ;;  %v837_v16 = vmul.f32 %v645_v11, %v645_v11 }
  0xd6   :  { %v569_v4 = vpop.permute.xlu1 %568  ;;  %v896_v8 = vadd.f32 %v895_v1, %v833_v62  ;;  %v644_v10 = vsub.f32 0.0, %v563_v5 }
  0xd7   :  { %v647_v18 = vsub.f32 0.0, %v569_v4 }
  0xd8   :  { %v897_v12 = vadd.f32 %v896_v8, %v834_v3  ;;  %v836_v13 = vmul.f32 %v644_v10, %v644_v10 }
  0xd9   :  { %v567_v14 = vpop.permute.xlu0 %566  ;;  %v839_v24 = vmul.f32 %v647_v18, %v647_v18 }
  0xda   :  { %v573_v2 = vpop.permute.xlu1 %572  ;;  %v898_v15 = vadd.f32 %v897_v12, %v835_v9  ;;  %v646_v17 = vsub.f32 0.0, %v567_v14 }
  0xdb   :  { %v649_v25 = vsub.f32 0.0, %v573_v2 }
  0xdc   :  { %v899_v19 = vadd.f32 %v898_v15, %v836_v13  ;;  %v838_v20 = vmul.f32 %v646_v17, %v646_v17 }
  0xdd   :  { %v571_v22 = vpop.permute.xlu0 %570  ;;  %v841_v31 = vmul.f32 %v649_v25, %v649_v25 }
  0xde   :  { %v577_v21 = vpop.permute.xlu1 %576  ;;  %v900_v23 = vadd.f32 %v899_v19, %v837_v16  ;;  %v648_v6 = vsub.f32 0.0, %v571_v22 }
  0xdf   :  { %v651_v33 = vsub.f32 0.0, %v577_v21 }
  0xe0   :  { %v901_v26 = vadd.f32 %v900_v23, %v838_v20  ;;  %v840_v27 = vmul.f32 %v648_v6, %v648_v6 }
  0xe1   :  { %v575_v29 = vpop.permute.xlu0 %574  ;;  %v843_v39 = vmul.f32 %v651_v33, %v651_v33 }
  0xe2   :  { %v581_v28 = vpop.permute.xlu1 %580  ;;  %v902_v30 = vadd.f32 %v901_v26, %v839_v24  ;;  %v650_v32 = vsub.f32 0.0, %v575_v29 }
  0xe3   :  { %v653_v41 = vsub.f32 0.0, %v581_v28 }
  0xe4   :  { %v903_v34 = vadd.f32 %v902_v30, %v840_v27  ;;  %v842_v35 = vmul.f32 %v650_v32, %v650_v32 }
  0xe5   :  { %v579_v37 = vpop.permute.xlu0 %578  ;;  %v845_v47 = vmul.f32 %v653_v41, %v653_v41 }
  0xe6   :  { %v585_v36 = vpop.permute.xlu1 %584  ;;  %v904_v38 = vadd.f32 %v903_v34, %v841_v31  ;;  %v652_v40 = vsub.f32 0.0, %v579_v37 }
  0xe7   :  { %v655_v49 = vsub.f32 0.0, %v585_v36 }
  0xe8   :  { %v905_v42 = vadd.f32 %v904_v38, %v842_v35  ;;  %v844_v43 = vmul.f32 %v652_v40, %v652_v40 }
  0xe9   :  { %v583_v45 = vpop.permute.xlu0 %582  ;;  %v847_v55 = vmul.f32 %v655_v49, %v655_v49 }
  0xea   :  { %v589_v44 = vpop.permute.xlu1 %588  ;;  %v906_v46 = vadd.f32 %v905_v42, %v843_v39  ;;  %v654_v48 = vsub.f32 0.0, %v583_v45 }
  0xeb   :  { %v657_v57 = vsub.f32 0.0, %v589_v44 }
  0xec   :  { %v907_v50 = vadd.f32 %v906_v46, %v844_v43  ;;  %v846_v51 = vmul.f32 %v654_v48, %v654_v48 }
  0xed   :  { %v587_v52 = vpop.permute.xlu0 %586  ;;  %v849_v63 = vmul.f32 %v657_v57, %v657_v57 }
  0xee   :  { %v593_v53 = vpop.permute.xlu1 %592  ;;  %v908_v54 = vadd.f32 %v907_v50, %v845_v47  ;;  %v656_v56 = vsub.f32 0.0, %v587_v52 }
  0xef   :  { %v659_v1 = vsub.f32 0.0, %v593_v53 }
  0xf0   :  { %v909_v58 = vadd.f32 %v908_v54, %v846_v51  ;;  %v848_v59 = vmul.f32 %v656_v56, %v656_v56 }
  0xf1   :  { %v591_v61 = vpop.permute.xlu0 %590  ;;  %v851_v10 = vmul.f32 %v659_v1, %v659_v1 }
  0xf2   :  { %v910_v62 = vadd.f32 %v909_v58, %v847_v55  ;;  %v658_v0 = vsub.f32 0.0, %v591_v61  ;;  %v597_v3 = vpop.permute.xlu1 %596 }
  0xf3   :  { %v661_v12 = vsub.f32 0.0, %v597_v3 }
  0xf4   :  { %v911_v4 = vadd.f32 %v910_v62, %v848_v59  ;;  %v850_v5 = vmul.f32 %v658_v0, %v658_v0 }
  0xf5   :  { %v595_v8 = vpop.permute.xlu0 %594  ;;  %v853_v15 = vmul.f32 %v661_v12, %v661_v12 }
  0xf6   :  { %v912_v9 = vadd.f32 %v911_v4, %v849_v63  ;;  %v660_v11 = vsub.f32 0.0, %v595_v8 }
  0xf8   :  { %v913_v13 = vadd.f32 %v912_v9, %v850_v5  ;;  %v852_v2 = vmul.f32 %v660_v11, %v660_v11 }
  0xfa   :  { %v914_v14 = vadd.f32 %v913_v13, %v851_v10 }
  0xfc   :  { %v915_v16 = vadd.f32 %v914_v14, %v852_v2 }
  0xfe   :  { %v916_v17 = vadd.f32 %v915_v16, %v853_v15 }
 0x100   :  { %v966_v18 = vsel %vm965_vm2, %v916_v17, 0.0 }
 0x101   :  { %967 = vadd.xlane.f32.xlu0 %v966_v18 }
 0x12f   :  { %v944_v19 = vpop.xlane.xlu0 %943 }
 0x130   :  { %v945_v21 = vrot.slane %v944_v19, 4 }
 0x131   :  { %v956_v20 = vpop.xlane.xlu1 %955 }
 0x132   :  { %v957_v22 = vrot.slane %v956_v20, 4  ;;  %v946_v23 = vadd.f32 %v945_v21, %v944_v19 }
 0x134   :  { %v958_v24 = vadd.f32 %v957_v22, %v956_v20  ;;  %v947_v6 = vrot.slane %v946_v23, 2 }
 0x136   :  { %v959_v25 = vrot.slane %v958_v24, 2  ;;  %v948_v27 = vadd.f32 %v947_v6, %v946_v23 }
 0x138   :  { %v960_v26 = vadd.f32 %v959_v25, %v958_v24  ;;  %v949_v28 = vrot.slane %v948_v27, 1 }
 0x13a   :  { %v961_v29 = vrot.slane %v960_v26, 1  ;;  %v950_v30 = vadd.f32 %v949_v28, %v948_v27 }
 0x13c   :  { %v962_v31 = vadd.f32 %v961_v29, %v960_v26  ;;  %995 = vpush %v950_v30 }
 0x13e   :  { %997 = vpush %v962_v31 }
 0x16d   :  { %s996_s0 = spop %995 }
 0x16e   :  { %s952_s14 = smul.f32 0.001953125, %s996_s0 }
 0x16f   :  { %s998_s1 = spop %997 }
 0x170   :  { %s964_s15 = smul.f32 0.009615385, %s998_s1 }
 0x172   :  { %s977_s19 = sadd.f32 %s964_s15, %s952_s14 }
 0x18e   :  { %v968_v60 = vpop.xlane.xlu0 %967 }
 0x18f   :  { %v969_v7 = vrot.slane %v968_v60, 4 }
 0x191   :  { %v970_v32 = vadd.f32 %v969_v7, %v968_v60 }
 0x193   :  { %v971_v33 = vrot.slane %v970_v32, 2 }
 0x195   :  { %v972_v34 = vadd.f32 %v971_v33, %v970_v32 }
 0x197   :  { %v973_v35 = vrot.slane %v972_v34, 1 }
 0x199   :  { %v974_v36 = vadd.f32 %v973_v35, %v972_v34 }
 0x19b   :  { %999 = vpush %v974_v36 }
 0x1cc   :  { %s1000_s16 = spop %999 }
 0x1cd   :  { %s976_s20 = smul.f32 0.002016129, %s1000_s16 }
 0x1cf   :  { %s978_s21 = sadd.f32 %s977_s19, %s976_s20 }
 0x1d1   :  { %v979_v37 = vstv %s978_s21 }
 0x1d2   :  { %980 = vst [vmem:[#allocation4] sm:$0x1] %v979_v37 }
 0x1d3   :  { %1015 = shalt.err (!%p1012_p4)
}
 0x1d4   :  { %s1016_s26 = scalar_lea.hbm %s1214_s2, 16 }
 0x1d5   :  { %p1017_p5 = scmp.ne.s32.totalorder %s1214_s2, %s1016_s26  ;;  %p1020_p6 = scmp.lt.u32.totalorder %s1016_s26, %s1214_s2 }
 0x1d7   :  { %p1022_p7 = pnand %p1020_p6, %p1017_p5 }
 0x1d9   :  { %1025 = shalt.err (!%p1022_p7)
}
 0x1da   :  { %990 = dma.vmem_to_hbm [thread:$0]  %s988_s18, 16, %s1214_s2, [#allocation5]  }
 0x1db   :  { %1026 = dma.done.wait [#allocation5], 16  }
 0x1dc   :  { %1027 = vsyncadd [#allocation5], 4294967280 }
 0x1dd   :  { %994 = vsyncpa [#allocation5], 1 }

</bundles_post_ra>
